<compile_context>
chip_gen: v7x
topology: tpu7x:2x2x1
jax: 0.10.0
libtpu: 0.0.40
codegen_flags: <defaults>
</compile_context>

<pallas_src>
from typing import NamedTuple

import jax
import jax.numpy as jnp
from jax.experimental import pallas as pl
from jax.experimental.pallas import tpu as pltpu


# ---------------------------------------------------------------------------
# Kernel
# ---------------------------------------------------------------------------

def _autoencoder_kernel(x_ref, we_ref, be_ref, wd_ref, bd_ref, o_ref):
    # Encoder: Linear (bf16 operands, f32 MXU accumulation) + bias + ReLU (f32).
    x = x_ref[...].astype(jnp.bfloat16)
    h = jnp.dot(x, we_ref[...], preferred_element_type=jnp.float32)
    h = jnp.maximum(h + be_ref[...], 0.0)            # be_ref: (1, Hp), broadcasts
    # Decoder: Linear (bf16 operands, f32 acc) + bias + Sigmoid.
    y = jnp.dot(h.astype(jnp.bfloat16), wd_ref[...],
                preferred_element_type=jnp.float32)
    y = y + bd_ref[...]                              # bd_ref: (1, Dp)
    # sigmoid(y) == 0.5 * (tanh(y/2) + 1): tanh issues on the EUP slot,
    # keeping the divide off the VALU slots.
    o_ref[...] = (0.5 * (jnp.tanh(0.5 * y) + 1.0)).astype(o_ref.dtype)


# ---------------------------------------------------------------------------
# Helpers (chip-aware sizing, all resolved at trace time)
# ---------------------------------------------------------------------------

def _round_up(x, m):
    return (x + m - 1) // m * m


def _chip_kind():
    try:
        return jax.devices()[0].device_kind.lower()
    except Exception:
        return ""


def _hidden_align():
    # v6e / v7x MXUs are 256 wide: pad the hidden dim to 256 so the systolic
    # array stays filled. v5e's 128x128 MXU is already matched at 128.
    kind = _chip_kind()
    return 256 if ("v6" in kind or "v7" in kind) else 128


def _vmem_cap_bytes():
    kind = _chip_kind()
    if "v7" in kind:
        return 40 << 20            # 64 MiB/TC physical -> leave headroom
    if any(v in kind for v in ("v4", "v5", "v6")):
        return 100 << 20           # 128 MiB physical VMEM
    return 48 << 20                # unknown chip: conservative


def _want_two_tiles():
    # v7x has two TensorCores per chip; a grid of (1,) would idle one of them.
    return "v7" in _chip_kind()


def _weight_bytes(Dp, Hp):
    return 2 * Dp * Hp * 2 + (Hp + Dp) * 4           # bf16 W_e + W_d, f32 biases


def _per_row_act_bytes(Dp, Hp):
    return (2 * 2 * Dp * 4        # f32 input + output tiles, double-buffered
            + 2 * Dp + 4 * Dp     # bf16 x copy + f32 pre-sigmoid temporary
            + 4 * Hp + 2 * Hp)    # f32 hidden + bf16 hidden copy


def _choose_batch_tiling(B, Dp, Hp, max_batch_tile):
    """Balanced batch tiling under the chip's VMEM budget."""
    cap = _vmem_cap_bytes()
    budget = int(cap * 0.8) - _weight_bytes(Dp, Hp)
    # TODO(synk): if the resident weights alone exceed the per-core VMEM budget
    # (very large D*Hid), a K/N-tiled weight path with an f32 accumulator
    # scratch would be needed; not implemented here.
    per_row = _per_row_act_bytes(Dp, Hp)
    cap_tb = (budget // per_row) // 8 * 8 if budget > 0 else 8
    max_tb = max(min(max_batch_tile, cap_tb), 8)

    n_tiles = max(pl.cdiv(B, max_tb), 1)
    if n_tiles == 1 and _want_two_tiles() and B >= 16:
        n_tiles = 2               # split the batch so both v7x TCs get work
    if n_tiles == 1:
        # Single full-batch tile: block shape equals the array dims, so no
        # sublane rounding and no batch padding is required.
        return B, B, 1
    TB = _round_up(pl.cdiv(B, n_tiles), 8)            # balanced, sublane-aligned
    return TB, TB * n_tiles, n_tiles


# ---------------------------------------------------------------------------
# One-off parameter preparation (hoisted out of the per-call path)
# ---------------------------------------------------------------------------

class PreparedParams(NamedTuple):
    we: jax.Array     # (Dp, Hp) bf16, zero-padded
    be: jax.Array     # (1, Hp)  f32,  zero-padded
    wd: jax.Array     # (Hp, Dp) bf16, zero-padded
    bd: jax.Array     # (1, Dp)  f32,  zero-padded


def prepare_params(w_enc, b_enc, w_dec, b_dec):
    """Pad + bf16-cast the weights once; reuse across forward calls."""
    D, Hid = w_enc.shape
    assert w_dec.shape == (Hid, D)
    assert b_enc.shape == (Hid,) and b_dec.shape == (D,)
    Dp = _round_up(D, 128)
    Hp = _round_up(Hid, _hidden_align())
    we = jnp.pad(w_enc.astype(jnp.float32),
                 ((0, Dp - D), (0, Hp - Hid))).astype(jnp.bfloat16)
    wd = jnp.pad(w_dec.astype(jnp.float32),
                 ((0, Hp - Hid), (0, Dp - D))).astype(jnp.bfloat16)
    be = jnp.pad(b_enc.astype(jnp.float32), (0, Hp - Hid)).reshape(1, Hp)
    bd = jnp.pad(b_dec.astype(jnp.float32), (0, Dp - D)).reshape(1, Dp)
    return PreparedParams(we=we, be=be, wd=wd, bd=bd)


# ---------------------------------------------------------------------------
# Forward pass
# ---------------------------------------------------------------------------

def autoencoder_forward(x_nchw, params: PreparedParams, *, max_batch_tile=512):
    """x_nchw: [B, C, H, W] float32. Returns decoded [B, C, H, W] float32."""
    B, C, H, W = x_nchw.shape
    D = C * H * W
    Dp, Hp = params.we.shape
    assert params.wd.shape == (Hp, Dp)
    assert params.be.shape == (1, Hp) and params.bd.shape == (1, Dp)
    assert Dp == _round_up(D, 128), "params were prepared for a different input dim"

    TB, Bp, n_tiles = _choose_batch_tiling(B, Dp, Hp, max_batch_tile)

    # Free reshape (row-major layout preserved). Pad only when strictly needed
    # (ragged last tile and/or D not 128-aligned); the aligned fast path adds
    # no extra HBM passes.
    x2d = x_nchw.reshape(B, D)
    if x2d.dtype != jnp.float32:
        x2d = x2d.astype(jnp.float32)
    if Bp != B or Dp != D:
        # TODO(synk): a ragged last batch tile is still padded in the wrapper;
        # in-kernel row masking would avoid this extra HBM pass.
        x2d = jnp.pad(x2d, ((0, Bp - B), (0, Dp - D)))

    cost = pl.CostEstimate(
        flops=4 * Bp * Dp * Hp,                       # two matmuls, 2*M*N*K each
        transcendentals=Bp * Dp,                      # sigmoid (tanh)
        bytes_accessed=2 * Bp * Dp * 4                # activations in + out (f32)
                       + (params.we.size + params.wd.size) * 2
                       + (params.be.size + params.bd.size) * 4,
    )

    weight_bytes = _weight_bytes(Dp, Hp)
    act_bytes = TB * _per_row_act_bytes(Dp, Hp)
    vmem_limit = int(min(_vmem_cap_bytes(),
                         max(32 << 20, 3 * (weight_bytes + act_bytes) // 2)))

    def resident():
        # Whole-array, single-buffered, VMEM-resident operand (no grid blocking).
        return pl.BlockSpec(memory_space=pltpu.MemorySpace.VMEM)

    out2d = pl.pallas_call(
        _autoencoder_kernel,
        out_shape=jax.ShapeDtypeStruct((Bp, Dp), jnp.float32),
        grid_spec=pltpu.PrefetchScalarGridSpec(
            num_scalar_prefetch=0,
            grid=(n_tiles,),
            in_specs=[
                pl.BlockSpec((TB, Dp), lambda i: (i, 0)),  # x tiles stream
                resident(),                                # w_enc  (Dp, Hp) bf16
                resident(),                                # b_enc  (1, Hp)  f32
                resident(),                                # w_dec  (Hp, Dp) bf16
                resident(),                                # b_dec  (1, Dp)  f32
            ],
            out_specs=pl.BlockSpec((TB, Dp), lambda i: (i, 0)),
        ),
        compiler_params=pltpu.CompilerParams(
            dimension_semantics=("parallel",),             # megacore-shardable
            vmem_limit_bytes=vmem_limit,
        ),
        cost_estimate=cost,
    )(x2d, params.we, params.be, params.wd, params.bd)

    if Bp != B or Dp != D:
        out2d = out2d[:B, :D]
    return out2d.reshape(B, C, H, W)


# ---------------------------------------------------------------------------
# Reference + test harness
# ---------------------------------------------------------------------------

def _reference(x_nchw, w_enc, b_enc, w_dec, b_dec):
    """Plain-JAX mirror of the kernel math (bf16 weights, f32 accumulation)."""
    B, C, H, W = x_nchw.shape
    D = C * H * W
    x2d = x_nchw.reshape(B, D)
    h = jnp.dot(x2d.astype(jnp.bfloat16), w_enc.astype(jnp.bfloat16),
                preferred_element_type=jnp.float32)
    h = jnp.maximum(h + b_enc, 0.0)
    y = jnp.dot(h.astype(jnp.bfloat16), w_dec.astype(jnp.bfloat16),
                preferred_element_type=jnp.float32)
    y = jax.nn.sigmoid(y + b_dec)
    return y.reshape(B, C, H, W)


def _init_params(key, d_in, d_hidden):
    """Deterministic init mimicking nn.Linear default (uniform +/- 1/sqrt(fan_in))."""
    k1, k2, k3, k4 = jax.random.split(key, 4)
    lim_e = 1.0 / jnp.sqrt(jnp.float32(d_in))
    lim_d = 1.0 / jnp.sqrt(jnp.float32(d_hidden))
    w_enc = jax.random.uniform(k1, (d_in, d_hidden), jnp.float32, -lim_e, lim_e)
    b_enc = jax.random.uniform(k2, (d_hidden,), jnp.float32, -lim_e, lim_e)
    w_dec = jax.random.uniform(k3, (d_hidden, d_in), jnp.float32, -lim_d, lim_d)
    b_dec = jax.random.uniform(k4, (d_in,), jnp.float32, -lim_d, lim_d)
    return w_enc, b_enc, w_dec, b_dec


if __name__ == "__main__":
    key = jax.random.PRNGKey(0)
    kx, kp, kx2 = jax.random.split(key, 3)

    B, C, Himg, Wimg = 2, 4, 16, 16          # NCHW input, D = 1024
    D = C * Himg * Wimg
    HIDDEN = 128

    x = jax.random.normal(kx, (B, C, Himg, Wimg), jnp.float32)
    w_enc, b_enc, w_dec, b_dec = _init_params(kp, D, HIDDEN)

    # One-off weight prep (pad + bf16 cast), reused across all forward calls.
    params = prepare_params(w_enc, b_enc, w_dec, b_dec)

    fwd = jax.jit(autoencoder_forward, static_argnames=("max_batch_tile",))

    # Case 1: spec-sized input (B=2) -- single full-batch tile, zero-copy
    # wrapper path (no pad / slice since D % 128 == 0 and one tile == B).
    out = jax.block_until_ready(fwd(x, params))
    ref = _reference(x, w_enc, b_enc, w_dec, b_dec)
    assert out.shape == (B, C, Himg, Wimg)
    assert jnp.allclose(out, ref, atol=1e-3, rtol=1e-3)

    # Case 2: larger ragged batch with a small batch tile -> multi-step grid
    # exercising the streaming activation pipeline and balanced tiling.
    B2 = 20
    x2 = jax.random.normal(kx2, (B2, C, Himg, Wimg), jnp.float32)
    out2 = jax.block_until_ready(fwd(x2, params, max_batch_tile=8))
    ref2 = _reference(x2, w_enc, b_enc, w_dec, b_dec)
    assert out2.shape == (B2, C, Himg, Wimg)
    assert jnp.allclose(out2, ref2, atol=1e-3, rtol=1e-3)

    print("KERNEL_OK")
</pallas_src>

<mosaic_0001>
module attributes {stable_mosaic.version = 11 : i64} {
  func.func @_autoencoder_kernel(%arg0: i32, %arg1: memref<2x1024xf32, #tpu.memory_space<vmem>>, %arg2: memref<1024x128xbf16, #tpu.memory_space<vmem>>, %arg3: memref<1x128xf32, #tpu.memory_space<vmem>>, %arg4: memref<128x1024xbf16, #tpu.memory_space<vmem>>, %arg5: memref<1x1024xf32, #tpu.memory_space<vmem>>, %arg6: memref<2x1024xf32, #tpu.memory_space<vmem>>) attributes {dimension_semantics = [#tpu.dimension_semantics<parallel>], iteration_bounds = array<i64: 1>, scalar_prefetch = 0 : i64, scratch_operands = 0 : i64, tpu.core_type = #tpu.core_type<tc>, window_params = [{transform_indices = @transform_0, window_bounds = array<i64: 2, 1024>}, {pipeline_mode = #tpu.pipeline_mode<synchronous>, transform_indices = @transform_1, window_bounds = array<i64: 1024, 128>}, {pipeline_mode = #tpu.pipeline_mode<synchronous>, transform_indices = @transform_2, window_bounds = array<i64: 1, 128>}, {pipeline_mode = #tpu.pipeline_mode<synchronous>, transform_indices = @transform_3, window_bounds = array<i64: 128, 1024>}, {pipeline_mode = #tpu.pipeline_mode<synchronous>, transform_indices = @transform_4, window_bounds = array<i64: 1, 1024>}, {transform_indices = @transform_5, window_bounds = array<i64: 2, 1024>}]} {
    %c0 = arith.constant 0 : index
    %c0_0 = arith.constant 0 : index
    %0 = vector.load %arg1[%c0, %c0_0] : memref<2x1024xf32, #tpu.memory_space<vmem>>, vector<2x1024xf32>
    %1 = arith.truncf %0 : vector<2x1024xf32> to vector<2x1024xbf16>
    %c0_1 = arith.constant 0 : index
    %c0_2 = arith.constant 0 : index
    %2 = vector.load %arg2[%c0_1, %c0_2] : memref<1024x128xbf16, #tpu.memory_space<vmem>>, vector<1024x128xbf16>
    %cst = arith.constant dense<0.000000e+00> : vector<2x128xf32>
    %3 = tpu.matmul %1, %2, %cst {dimension_numbers = #tpu.dot_dimension_numbers<[1], [0], [0], [1], [0, 0, 1, 1], [], []>} : vector<2x1024xbf16>, vector<1024x128xbf16>, vector<2x128xf32> -> vector<2x128xf32>
    %c0_3 = arith.constant 0 : index
    %c0_4 = arith.constant 0 : index
    %4 = vector.load %arg3[%c0_3, %c0_4] : memref<1x128xf32, #tpu.memory_space<vmem>>, vector<1x128xf32>
    %5 = vector.broadcast %4 : vector<1x128xf32> to vector<2x128xf32>
    %6 = arith.addf %3, %5 : vector<2x128xf32>
    %cst_5 = arith.constant 0.000000e+00 : f32
    %7 = vector.broadcast %cst_5 : f32 to vector<2x128xf32>
    %8 = arith.maximumf %6, %7 : vector<2x128xf32>
    %9 = arith.truncf %8 : vector<2x128xf32> to vector<2x128xbf16>
    %c0_6 = arith.constant 0 : index
    %c0_7 = arith.constant 0 : index
    %10 = vector.load %arg4[%c0_6, %c0_7] : memref<128x1024xbf16, #tpu.memory_space<vmem>>, vector<128x1024xbf16>
    %cst_8 = arith.constant dense<0.000000e+00> : vector<2x1024xf32>
    %11 = tpu.matmul %9, %10, %cst_8 {dimension_numbers = #tpu.dot_dimension_numbers<[1], [0], [0], [1], [0, 0, 1, 1], [], []>} : vector<2x128xbf16>, vector<128x1024xbf16>, vector<2x1024xf32> -> vector<2x1024xf32>
    %c0_9 = arith.constant 0 : index
    %c0_10 = arith.constant 0 : index
    %12 = vector.load %arg5[%c0_9, %c0_10] : memref<1x1024xf32, #tpu.memory_space<vmem>>, vector<1x1024xf32>
    %13 = vector.broadcast %12 : vector<1x1024xf32> to vector<2x1024xf32>
    %14 = arith.addf %11, %13 : vector<2x1024xf32>
    %cst_11 = arith.constant 5.000000e-01 : f32
    %15 = vector.broadcast %cst_11 : f32 to vector<2x1024xf32>
    %16 = arith.mulf %15, %14 : vector<2x1024xf32>
    %17 = math.tanh %16 : vector<2x1024xf32>
    %cst_12 = arith.constant 1.000000e+00 : f32
    %18 = vector.broadcast %cst_12 : f32 to vector<2x1024xf32>
    %19 = arith.addf %17, %18 : vector<2x1024xf32>
    %cst_13 = arith.constant 5.000000e-01 : f32
    %20 = vector.broadcast %cst_13 : f32 to vector<2x1024xf32>
    %21 = arith.mulf %20, %19 : vector<2x1024xf32>
    %c0_14 = arith.constant 0 : index
    %c0_15 = arith.constant 0 : index
    %22 = vector.load %arg6[%c0_14, %c0_15] : memref<2x1024xf32, #tpu.memory_space<vmem>>, vector<2x1024xf32>
    tpu.vector_store %arg6[%c0_14, %c0_15], %21 {strides = array<i32>} : memref<2x1024xf32, #tpu.memory_space<vmem>>, vector<2x1024xf32>,
    return
  }
  func.func @transform_0(%arg0: i32) -> (i32, i32) {
    %c0_i32 = arith.constant 0 : i32
    %c0_i32_0 = arith.constant 0 : i32
    return %arg0, %c0_i32 : i32, i32
  }
  func.func @transform_1(%arg0: i32) -> (i32, i32) {
    %c0_i32 = arith.constant 0 : i32
    %c0_i32_0 = arith.constant 0 : i32
    %c0_i32_1 = arith.constant 0 : i32
    return %c0_i32, %c0_i32_0 : i32, i32
  }
  func.func @transform_2(%arg0: i32) -> (i32, i32) {
    %c0_i32 = arith.constant 0 : i32
    %c0_i32_0 = arith.constant 0 : i32
    %c0_i32_1 = arith.constant 0 : i32
    return %c0_i32, %c0_i32_0 : i32, i32
  }
  func.func @transform_3(%arg0: i32) -> (i32, i32) {
    %c0_i32 = arith.constant 0 : i32
    %c0_i32_0 = arith.constant 0 : i32
    %c0_i32_1 = arith.constant 0 : i32
    return %c0_i32, %c0_i32_0 : i32, i32
  }
  func.func @transform_4(%arg0: i32) -> (i32, i32) {
    %c0_i32 = arith.constant 0 : i32
    %c0_i32_0 = arith.constant 0 : i32
    %c0_i32_1 = arith.constant 0 : i32
    return %c0_i32, %c0_i32_0 : i32, i32
  }
  func.func @transform_5(%arg0: i32) -> (i32, i32) {
    %c0_i32 = arith.constant 0 : i32
    %c0_i32_0 = arith.constant 0 : i32
    return %arg0, %c0_i32 : i32, i32
  }
}

</mosaic_0001>

<bundles_post_ra>
// kernel: autoencoder_forward.1
= control target key start
LH: loop header
LB: loop body
LE: loop exit
PB: predicated region body
PF: predicated region fallthrough
CT: control target
= control target key end

     0   :  { %10 = vsyncpa [#allocation3], 0  ;;  %s1920_s0 = inlined_call_operand.vmem [shape: f32[2,1024], index: 0, kind: input, shape index: {}]   ;;  %s1921_s1 = inlined_call_operand.hbm [shape: bf16[1024,128], index: 1, kind: input, shape index: {}]   ;;  %s1922_s2 = inlined_call_operand.vmem [shape: f32[1,128], index: 2, kind: input, shape index: {}]   ;;  %s1923_s3 = inlined_call_operand.hbm [shape: bf16[128,1024], index: 3, kind: input, shape index: {}]   ;;  %s1924_s4 = inlined_call_operand.vmem [shape: f32[1,1024], index: 4, kind: input, shape index: {}]   ;;  %s1925_s5 = inlined_call_operand.vmem [shape: f32[2,1024], index: 5, kind: output, shape index: {}]  }
   0x1   :  { %11 = vsyncpa [#allocation5], 0  ;;  %s1813_s18 = smov [#allocation2]   ;;  %s1765_s22 = scalar_lea.hbm %s1921_s1, 8192 }
   0x2   :  { %s19_s19 = sshll.u32 %s1813_s18, 4  ;;  %p1766_p0 = scmp.ne.s32.totalorder %s1921_s1, %s1765_s22  ;;  %s20_s19 = int_to_ptr.vmem [resolvable:$true] %s19_s19 }
   0x3   :  { %p1769_p1 = scmp.lt.u32.totalorder %s1765_s22, %s1921_s1 }
   0x5   :  { %p1771_p2 = pnand %p1769_p1, %p1766_p0 }
   0x7   :  { %1774 = shalt.err (!%p1771_p2)
}
   0x8   :  { %s1775_s27 = scalar_lea.vmem %s20_s19, 8192  ;;  %p1780_p4 = scmp.lt.s32.totalorder %s20_s19, %s20_s19 }
   0x9   :  { %p1776_p3 = scmp.ne.s32.totalorder %s20_s19, %s1775_s27  ;;  %p1781_p5 = scmp.lt.s32.totalorder %s1775_s27, %s1775_s27 }
   0xb   :  { %p1782_p6 = por %p1781_p5, %p1780_p4 }
   0xd   :  { %p1783_p7 = pnand %p1782_p6, %p1776_p3 }
   0xf   :  { %1786 = shalt.err (!%p1783_p7)
}
  0x10   :  { %s1814_s28 = smov 64   ;;  %s1815_s29 = smov 4  }
  0x11   :  { %25 = dma.hbm_to_vmem [thread:$0]  %s1921_s1, 8192, %s20_s19, [#allocation3], %s1814_s28, %s1814_s28, %s1815_s29  }
  0x12   :  { %s1816_s7 = smov [#allocation4]   ;;  %s1787_s11 = scalar_lea.hbm %s1923_s3, 8192 }
  0x13   :  { %s33_s8 = sshll.u32 %s1816_s7, 4  ;;  %p1788_p8 = scmp.ne.s32.totalorder %s1923_s3, %s1787_s11  ;;  %s34_s8 = int_to_ptr.vmem [resolvable:$true] %s33_s8 }
  0x14   :  { %p1791_p9 = scmp.lt.u32.totalorder %s1787_s11, %s1923_s3 }
  0x16   :  { %p1793_p10 = pnand %p1791_p9, %p1788_p8 }
  0x18   :  { %1796 = shalt.err (!%p1793_p10)
}
  0x19   :  { %s1797_s16 = scalar_lea.vmem %s34_s8, 8192  ;;  %p1802_p12 = scmp.lt.s32.totalorder %s34_s8, %s34_s8 }
  0x1a   :  { %p1798_p11 = scmp.ne.s32.totalorder %s34_s8, %s1797_s16  ;;  %p1803_p13 = scmp.lt.s32.totalorder %s1797_s16, %s1797_s16 }
  0x1c   :  { %p1804_p0 = por %p1803_p13, %p1802_p12 }
  0x1e   :  { %p1805_p1 = pnand %p1804_p0, %p1798_p11 }
  0x20   :  { %1808 = shalt.err (!%p1805_p1)
}
  0x21   :  { %s1817_s1 = smov 512   ;;  %s1818_s17 = smov 32  }
  0x22   :  { %39 = dma.hbm_to_vmem [thread:$0]  %s1923_s3, 8192, %s34_s8, [#allocation5], %s1817_s1, %s1817_s1, %s1818_s17  }
  0x23   :  { %1809 = dma.done.wait [#allocation3], 8192  }
  0x24   :  { %1810 = vsyncadd [#allocation3], 4294959104 }
  0x25   :  { %1811 = dma.done.wait [#allocation5], 8192  }
  0x26   :  { %1812 = vsyncadd [#allocation5], 4294959104  ;;  %v1683_v0 = vld [vmem:[#allocation2 + $0x40] sm:$0xff]   ;;  %v1687_v4 = vld [vmem:[#allocation2 + $0x48] sm:$0xff]   ;;  %v1819_v22 = vmov 1983009808   ;;  %v57_v24 = vlaneseq }
  0x27   :  { %v1684_v1 = vld [vmem:[#allocation2 + $0xc0] sm:$0xff]   ;;  %1587 = vmatprep.subr.bf16.mxu0 %v1683_v0  ;;  %v1688_v5 = vld [vmem:[#allocation2 + $0xc8] sm:$0xff]   ;;  %v1691_v8 = vld [vmem:[#allocation2 + $0x50] sm:$0xff]   ;;  %v55_v23 = vunpack.c.l.s4 %v1819_v22 }
  0x28   :  { %v1685_v2 = vld [vmem:[#allocation2] sm:$0xff]   ;;  %1609 = vmatprep.subr.bf16.mxu1 %v1684_v1  ;;  %v1689_v6 = vld [vmem:[#allocation2 + $0x8] sm:$0xff]   ;;  %v1692_v9 = vld [vmem:[#allocation2 + $0xd0] sm:$0xff]   ;;  %v1875_v30 = vshrl.u32 %v57_v24, 7 }
  0x29   :  { %v1686_v3 = vld [vmem:[#allocation2 + $0x80] sm:$0xff]   ;;  %1588 = vmatpush3.bf16.msra.mxu0 %v1685_v2  ;;  %v1690_v7 = vld [vmem:[#allocation2 + $0x88] sm:$0xff]   ;;  %v1693_v10 = vld [vmem:[#allocation2 + $0x10] sm:$0xff]   ;;  %v56_v29 = vunpack.c.0.s8 %v55_v23 }
  0x2a   :  { %1610 = vmatpush3.bf16.msra.mxu1 %v1686_v3  ;;  %1589 = vmatprep.subr.bf16.mxu0 %v1687_v4  ;;  %v1694_v11 = vld [vmem:[#allocation2 + $0x90] sm:$0xff]   ;;  %v1695_v12 = vld [vmem:[#allocation2 + $0x58] sm:$0xff]   ;;  %v1699_v16 = vld [vmem:[#allocation2 + $0x60] sm:$0xff]  }
  0x2b   :  { %1611 = vmatprep.subr.bf16.mxu1 %v1688_v5  ;;  %v1696_v13 = vld [vmem:[#allocation2 + $0xd8] sm:$0xff]   ;;  %v1700_v17 = vld [vmem:[#allocation2 + $0xe0] sm:$0xff]   ;;  %v1703_v20 = vld [vmem:[#allocation2 + $0x68] sm:$0xff]   ;;  %v1878_v35 = vsub.s32 %v56_v29, %v1875_v30 }
  0x2c   :  { %v1697_v14 = vld [vmem:[#allocation2 + $0x18] sm:$0xff]   ;;  %v1701_v18 = vld [vmem:[#allocation2 + $0x20] sm:$0xff]   ;;  %v1704_v21 = vld [vmem:[#allocation2 + $0xe8] sm:$0xff]  }
  0x2d   :  { %1590 = vmatpush3.bf16.msra.mxu0 %v1689_v6  ;;  %v1698_v15 = vld [vmem:[#allocation2 + $0x98] sm:$0xff]   ;;  %v1702_v19 = vld [vmem:[#allocation2 + $0xa0] sm:$0xff]   ;;  %v1705_v25 = vld [vmem:[#allocation2 + $0x28] sm:$0xff]  }
  0x2e   :  { %1612 = vmatpush3.bf16.msra.mxu1 %v1690_v7  ;;  %1591 = vmatprep.subr.bf16.mxu0 %v1691_v8  ;;  %v1706_v26 = vld [vmem:[#allocation2 + $0xa8] sm:$0xff]   ;;  %v1707_v27 = vld [vmem:[#allocation2 + $0x70] sm:$0xff]   ;;  %v1711_v33 = vld [vmem:[#allocation2 + $0x78] sm:$0xff]  }
  0x2f   :  { %1613 = vmatprep.subr.bf16.mxu1 %v1692_v9  ;;  %v1708_v28 = vld [vmem:[#allocation2 + $0xf0] sm:$0xff]   ;;  %v1712_v34 = vld [vmem:[#allocation2 + $0xf8] sm:$0xff]   ;;  %v49_v38 = vld [vmem:[%s1920_s0] sm:$0xff] }
  0x30   :  { %v1709_v31 = vld [vmem:[#allocation2 + $0x30] sm:$0xff]   ;;  %v1713_v36 = vld [vmem:[#allocation2 + $0x38] sm:$0xff]   ;;  %v60_v39 = vrot.slane %v49_v38, %v1878_v35  ;;  %v53_v40 = vcombine.high %v49_v38, %v49_v38  ;;  %v1716_v41 = vld [vmem:[#allocation2 + $0x140] sm:$0xff]  }
  0x31   :  { %1592 = vmatpush3.bf16.msra.mxu0 %v1693_v10  ;;  %v1710_v32 = vld [vmem:[#allocation2 + $0xb0] sm:$0xff]   ;;  %v1714_v37 = vld [vmem:[#allocation2 + $0xb8] sm:$0xff]   ;;  %v1717_v42 = vld [vmem:[#allocation2 + $0x1c0] sm:$0xff]  }
  0x32   :  { %1614 = vmatpush3.bf16.msra.mxu1 %v1694_v11  ;;  %1593 = vmatprep.subr.bf16.mxu0 %v1695_v12  ;;  %v68_v43 = vcombine.high %v60_v39, %v60_v39  ;;  %v67_v44 = vrot.slane %v53_v40, %v1878_v35  ;;  %v95_v45 = vpack.c.bf16 %v60_v39, %v60_v39  ;;  %v1718_v48 = vld [vmem:[#allocation2 + $0x100] sm:$0xff]   ;;  %v1720_v50 = vld [vmem:[#allocation2 + $0x148] sm:$0xff]   ;;  %v1724_v55 = vld [vmem:[#allocation2 + $0x150] sm:$0xff]  }
  0x33   :  { %1615 = vmatprep.subr.bf16.mxu1 %v1696_v13  ;;  %v1719_v52 = vld [vmem:[#allocation2 + $0x180] sm:$0xff]   ;;  %v1721_v53 = vld [vmem:[#allocation2 + $0x1c8] sm:$0xff]   ;;  %v1725_v57 = vld [vmem:[#allocation2 + $0x1d0] sm:$0xff]  }
  0x34   :  { %v96_v46 = vpack.c.bf16 %v68_v43, %v68_v43  ;;  %v69_v47 = vcombine.high %v67_v44, %v67_v44  ;;  %v97_v49 = vpack.c.bf16 %v67_v44, %v67_v44  ;;  %v1722_v54 = vld [vmem:[#allocation2 + $0x108] sm:$0xff]   ;;  %v1726_v58 = vld [vmem:[#allocation2 + $0x110] sm:$0xff]   ;;  %v1728_v59 = vld [vmem:[#allocation2 + $0x158] sm:$0xff]  }
  0x35   :  { %1594 = vmatpush3.bf16.msra.mxu0 %v1697_v14  ;;  %v1723_v56 = vld [vmem:[#allocation2 + $0x188] sm:$0xff]   ;;  %v1727_v60 = vld [vmem:[#allocation2 + $0x190] sm:$0xff]   ;;  %v1729_v61 = vld [vmem:[#allocation2 + $0x1d8] sm:$0xff]  }
  0x36   :  { %1616 = vmatpush3.bf16.msra.mxu1 %v1698_v15  ;;  %1595 = vmatprep.subr.bf16.mxu0 %v1699_v16  ;;  %v98_v51 = vpack.c.bf16 %v69_v47, %v69_v47  ;;  %v1730_v62 = vld [vmem:[#allocation2 + $0x118] sm:$0xff]   ;;  %v1732_v63 = vld [vmem:[#allocation2 + $0x160] sm:$0xff]   ;;  %v1736_v3 = vld [vmem:[#allocation2 + $0x168] sm:$0xff]  }
  0x37   :  { %1617 = vmatprep.subr.bf16.mxu1 %v1700_v17  ;;  %654 = vmatprep.mubr.bf16.mxu0 %v96_v46  ;;  %v1731_v0 = vld [vmem:[#allocation2 + $0x198] sm:$0xff]   ;;  %v1733_v1 = vld [vmem:[#allocation2 + $0x1e0] sm:$0xff]   ;;  %v1737_v5 = vld [vmem:[#allocation2 + $0x1e8] sm:$0xff]  }
  0x38   :  { %694 = vmatprep.mubr.bf16.mxu1 %v98_v51  ;;  %v1734_v2 = vld [vmem:[#allocation2 + $0x120] sm:$0xff]   ;;  %v1738_v6 = vld [vmem:[#allocation2 + $0x128] sm:$0xff]   ;;  %v1740_v7 = vld [vmem:[#allocation2 + $0x170] sm:$0xff]  }
  0x39   :  { %1596 = vmatpush3.bf16.msra.mxu0 %v1701_v18  ;;  %v1735_v4 = vld [vmem:[#allocation2 + $0x1a0] sm:$0xff]   ;;  %v1739_v8 = vld [vmem:[#allocation2 + $0x1a8] sm:$0xff]   ;;  %v1741_v9 = vld [vmem:[#allocation2 + $0x1f0] sm:$0xff]  }
  0x3a   :  { %1618 = vmatpush3.bf16.msra.mxu1 %v1702_v19  ;;  %1597 = vmatprep.subr.bf16.mxu0 %v1703_v20  ;;  %v1742_v10 = vld [vmem:[#allocation2 + $0x130] sm:$0xff]   ;;  %v1744_v11 = vld [vmem:[#allocation2 + $0x178] sm:$0xff]   ;;  %v50_v14 = vld [vmem:[%s1920_s0 + $0x8] sm:$0xff] }
  0x3b   :  { %1619 = vmatprep.subr.bf16.mxu1 %v1704_v21  ;;  %v1743_v12 = vld [vmem:[#allocation2 + $0x1b0] sm:$0xff]   ;;  %v1745_v13 = vld [vmem:[#allocation2 + $0x1f8] sm:$0xff]   ;;  %v77_v16 = vrot.slane %v50_v14, %v1878_v35  ;;  %v70_v17 = vcombine.high %v50_v14, %v50_v14  ;;  %v793_v39 = vld [vmem:[#allocation4 + $0x48] sm:$0xff] }
  0x3c   :  { %v1746_v15 = vld [vmem:[#allocation2 + $0x138] sm:$0xff]   ;;  %v797_v40 = vld [vmem:[#allocation4 + $0x68] sm:$0xff]  ;;  %v804_v43 = vld [vmem:[#allocation4 + $0xa0] sm:$0xff] }
  0x3d   :  { %1598 = vmatpush3.bf16.msra.mxu0 %v1705_v25  ;;  %v1747_v18 = vld [vmem:[#allocation2 + $0x1b8] sm:$0xff]   ;;  %v85_v19 = vcombine.high %v77_v16, %v77_v16  ;;  %v84_v20 = vrot.slane %v70_v17, %v1878_v35  ;;  %v99_v21 = vpack.c.bf16 %v77_v16, %v77_v16  ;;  %v801_v44 = vld [vmem:[#allocation4 + $0x88] sm:$0xff]  ;;  %v1533_v47 = vcombine.low %v793_v39, %v797_v40  ;;  %v812_v51 = vld [vmem:[#allocation4 + $0xe0] sm:$0xff] }
  0x3e   :  { %1620 = vmatpush3.bf16.msra.mxu1 %v1706_v26  ;;  %1599 = vmatprep.subr.bf16.mxu0 %v1707_v27  ;;  %v784_v26 = vld [vmem:[#allocation4] sm:$0xff]  ;;  %v833_v14 = vld [vmem:[#allocation4 + $0x188] sm:$0xff] }
  0x3f   :  { %1621 = vmatprep.subr.bf16.mxu1 %v1708_v28  ;;  %v100_v22 = vpack.c.bf16 %v85_v19, %v85_v19  ;;  %v86_v23 = vcombine.high %v84_v20, %v84_v20  ;;  %v101_v24 = vpack.c.bf16 %v84_v20, %v84_v20  ;;  %v788_v27 = vld [vmem:[#allocation4 + $0x20] sm:$0xff]  ;;  %v785_v28 = vld [vmem:[#allocation4 + $0x8] sm:$0xff] }
  0x40   :  { %v1523_v29 = vcombine.low %v784_v26, %v788_v27  ;;  %v837_v16 = vld [vmem:[#allocation4 + $0x1a8] sm:$0xff]  ;;  %v840_v20 = vld [vmem:[#allocation4 + $0x1c0] sm:$0xff] }
  0x41   :  { %1600 = vmatpush3.bf16.msra.mxu0 %v1709_v31  ;;  %v102_v25 = vpack.c.bf16 %v86_v23, %v86_v23  ;;  %v1524_v31 = vcombine.high %v784_v26, %v788_v27  ;;  %v1574_v19 = vcombine.high %v833_v14, %v837_v16 }
  0x42   :  { %1622 = vmatpush3.bf16.msra.mxu1 %v1710_v32  ;;  %1601 = vmatprep.subr.bf16.mxu0 %v1711_v33  ;;  %v789_v32 = vld [vmem:[#allocation4 + $0x28] sm:$0xff]  ;;  %v792_v33 = vld [vmem:[#allocation4 + $0x40] sm:$0xff] }
  0x43   :  { %1623 = vmatprep.subr.bf16.mxu1 %v1712_v34  ;;  %v796_v34 = vld [vmem:[#allocation4 + $0x60] sm:$0xff] }
  0x44   :  { %v1532_v38 = vcombine.high %v792_v33, %v796_v34  ;;  %v1531_v46 = vcombine.low %v792_v33, %v796_v34 }
  0x45   :  { %1602 = vmatpush3.bf16.msra.mxu0 %v1713_v36  ;;  %v1525_v36 = vcombine.low %v785_v28, %v789_v32 }
  0x46   :  { %1624 = vmatpush3.bf16.msra.mxu1 %v1714_v37  ;;  %1631 = vmatprep.subr.bf16.mxu0 %v1716_v41  ;;  %v1526_v37 = vcombine.high %v785_v28, %v789_v32  ;;  %v800_v41 = vld [vmem:[#allocation4 + $0x80] sm:$0xff]  ;;  %v786_v28 = vld [vmem:[#allocation4 + $0x10] sm:$0xff]  ;;  %v1820_v32 = vmov 0  }
  0x47   :  { %1653 = vmatprep.subr.bf16.mxu1 %v1717_v42  ;;  %v1534_v42 = vcombine.high %v793_v39, %v797_v40  ;;  %v1458_v40 = vld [vmem:[%s1922_s2] ss:$0 sm:$0xff] }
  0x48   :  { %655 = vmatmul.mubr.bf16.vlgmr.msra.gmra.mrb[0].mxu0 %v95_v45  ;;  %v805_v45 = vld [vmem:[#allocation4 + $0xa8] sm:$0xff] }
  0x49   :  { %1632 = vmatpush3.bf16.msra.mxu0 %v1718_v48  ;;  %695 = vmatmul.mubr.bf16.vlgmr.msra.gmra.mrb[0].mxu1 %v97_v49  ;;  %v1540_v48 = vcombine.high %v800_v41, %v804_v43  ;;  %v1542_v49 = vcombine.high %v801_v44, %v805_v45 }
  0x4a   :  { %1633 = vmatprep.subr.bf16.mxu0 %v1720_v50  ;;  %1654 = vmatpush3.bf16.msra.mxu1 %v1719_v52  ;;  %v808_v50 = vld [vmem:[#allocation4 + $0xc0] sm:$0xff]  ;;  %v809_v52 = vld [vmem:[#allocation4 + $0xc8] sm:$0xff] }
  0x4b   :  { %1655 = vmatprep.subr.bf16.mxu1 %v1721_v53  ;;  %734 = vmatprep.mubr.bf16.mxu0 %v100_v22  ;;  %v813_v53 = vld [vmem:[#allocation4 + $0xe8] sm:$0xff] }
  0x4c   :  { %774 = vmatprep.mubr.bf16.mxu1 %v102_v25  ;;  %v841_v22 = vld [vmem:[#allocation4 + $0x1c8] sm:$0xff] }
  0x4d   :  { %1634 = vmatpush3.bf16.msra.mxu0 %v1722_v54  ;;  %v1539_v54 = vcombine.low %v800_v41, %v804_v43 }
  0x4e   :  { %1635 = vmatprep.subr.bf16.mxu0 %v1724_v55  ;;  %1656 = vmatpush3.bf16.msra.mxu1 %v1723_v56  ;;  %v1541_v55 = vcombine.low %v801_v44, %v805_v45  ;;  %v1548_v56 = vcombine.high %v808_v50, %v812_v51 }
  0x4f   :  { %1657 = vmatprep.subr.bf16.mxu1 %v1725_v57  ;;  %v1550_v57 = vcombine.high %v809_v52, %v813_v53 }
  0x51   :  { %1636 = vmatpush3.bf16.msra.mxu0 %v1726_v58  ;;  %v816_v58 = vld [vmem:[#allocation4 + $0x100] sm:$0xff] }
  0x52   :  { %1637 = vmatprep.subr.bf16.mxu0 %v1728_v59  ;;  %1658 = vmatpush3.bf16.msra.mxu1 %v1727_v60  ;;  %v820_v59 = vld [vmem:[#allocation4 + $0x120] sm:$0xff]  ;;  %v817_v60 = vld [vmem:[#allocation4 + $0x108] sm:$0xff] }
  0x53   :  { %1659 = vmatprep.subr.bf16.mxu1 %v1729_v61  ;;  %v821_v61 = vld [vmem:[#allocation4 + $0x128] sm:$0xff] }
  0x55   :  { %1638 = vmatpush3.bf16.msra.mxu0 %v1730_v62  ;;  %v1547_v62 = vcombine.low %v808_v50, %v812_v51 }
  0x56   :  { %1639 = vmatprep.subr.bf16.mxu0 %v1732_v63  ;;  %1660 = vmatpush3.bf16.msra.mxu1 %v1731_v0  ;;  %v1549_v63 = vcombine.low %v809_v52, %v813_v53  ;;  %v1556_v0 = vcombine.high %v816_v58, %v820_v59 }
  0x57   :  { %1661 = vmatprep.subr.bf16.mxu1 %v1733_v1  ;;  %v1558_v1 = vcombine.high %v817_v60, %v821_v61 }
  0x59   :  { %1640 = vmatpush3.bf16.msra.mxu0 %v1734_v2  ;;  %v824_v2 = vld [vmem:[#allocation4 + $0x140] sm:$0xff] }
  0x5a   :  { %1641 = vmatprep.subr.bf16.mxu0 %v1736_v3  ;;  %1662 = vmatpush3.bf16.msra.mxu1 %v1735_v4  ;;  %v828_v3 = vld [vmem:[#allocation4 + $0x160] sm:$0xff]  ;;  %v825_v4 = vld [vmem:[#allocation4 + $0x148] sm:$0xff] }
  0x5b   :  { %1663 = vmatprep.subr.bf16.mxu1 %v1737_v5  ;;  %v829_v5 = vld [vmem:[#allocation4 + $0x168] sm:$0xff] }
  0x5d   :  { %1642 = vmatpush3.bf16.msra.mxu0 %v1738_v6  ;;  %v1555_v6 = vcombine.low %v816_v58, %v820_v59 }
  0x5e   :  { %1643 = vmatprep.subr.bf16.mxu0 %v1740_v7  ;;  %1664 = vmatpush3.bf16.msra.mxu1 %v1739_v8  ;;  %v1557_v7 = vcombine.low %v817_v60, %v821_v61  ;;  %v1564_v8 = vcombine.high %v824_v2, %v828_v3 }
  0x5f   :  { %1665 = vmatprep.subr.bf16.mxu1 %v1741_v9  ;;  %v1566_v9 = vcombine.high %v825_v4, %v829_v5 }
  0x61   :  { %1644 = vmatpush3.bf16.msra.mxu0 %v1742_v10  ;;  %v1563_v10 = vcombine.low %v824_v2, %v828_v3  ;;  %v795_v2 = vld [vmem:[#allocation4 + $0x58] sm:$0xff] }
  0x62   :  { %1645 = vmatprep.subr.bf16.mxu0 %v1744_v11  ;;  %1666 = vmatpush3.bf16.msra.mxu1 %v1743_v12  ;;  %v1565_v11 = vcombine.low %v825_v4, %v829_v5  ;;  %v832_v12 = vld [vmem:[#allocation4 + $0x180] sm:$0xff]  ;;  %v799_v3 = vld [vmem:[#allocation4 + $0x78] sm:$0xff] }
  0x63   :  { %1667 = vmatprep.subr.bf16.mxu1 %v1745_v13  ;;  %v836_v13 = vld [vmem:[#allocation4 + $0x1a0] sm:$0xff] }
  0x64   :  { %v1571_v17 = vcombine.low %v832_v12, %v836_v13 }
  0x65   :  { %1646 = vmatpush3.bf16.msra.mxu0 %v1746_v15  ;;  %v1572_v15 = vcombine.high %v832_v12, %v836_v13  ;;  %v1537_v13 = vcombine.low %v795_v2, %v799_v3 }
  0x66   :  { %1668 = vmatpush3.bf16.msra.mxu1 %v1747_v18  ;;  %1210 = vmatprep.subr.bf16.mxu0 %v1524_v31  ;;  %v1573_v18 = vcombine.low %v833_v14, %v837_v16  ;;  %v787_v31 = vld [vmem:[#allocation4 + $0x18] sm:$0xff]  ;;  %v810_v16 = vld [vmem:[#allocation4 + $0xd0] sm:$0xff] }
  0x67   :  { %1251 = vmatprep.subr.bf16.mxu1 %v1526_v37 }
  0x68   :  { %735 = vmatmul.mubr.bf16.vlgmr.msra.gmra.mrb[4].mxu0 %v99_v21  ;;  %v844_v21 = vld [vmem:[#allocation4 + $0x1e0] sm:$0xff] }
  0x69   :  { %775 = vmatmul.mubr.bf16.vlgmr.msra.gmra.mrb[4].mxu1 %v101_v24  ;;  %1211 = vmatpush1.bf16.msra.mxu0 %v1523_v29  ;;  %v1580_v23 = vcombine.high %v840_v20, %v844_v21  ;;  %v845_v24 = vld [vmem:[#allocation4 + $0x1e8] sm:$0xff]  ;;  %v1579_v25 = vcombine.low %v840_v20, %v844_v21  ;;  %v790_v29 = vld [vmem:[#allocation4 + $0x30] sm:$0xff] }
  0x6a   :  { %1252 = vmatpush1.bf16.msra.mxu1 %v1525_v36  ;;  %1212 = vmatprep.subr.bf16.mxu0 %v1532_v38  ;;  %v1581_v26 = vcombine.low %v841_v22, %v845_v24  ;;  %v1582_v27 = vcombine.high %v841_v22, %v845_v24  ;;  %v1527_v33 = vcombine.low %v786_v28, %v790_v29  ;;  %v791_v36 = vld [vmem:[#allocation4 + $0x38] sm:$0xff]  ;;  %v818_v24 = vld [vmem:[#allocation4 + $0x110] sm:$0xff] }
  0x6b   :  { %1253 = vmatprep.subr.bf16.mxu1 %v1534_v42  ;;  %1242 = vmatprep.mubr.bf16.mxu0 %v1820_v32  ;;  %v1528_v34 = vcombine.high %v786_v28, %v790_v29  ;;  %v1529_v37 = vcombine.low %v787_v31, %v791_v36  ;;  %v1530_v38 = vcombine.high %v787_v31, %v791_v36  ;;  %v827_v36 = vld [vmem:[#allocation4 + $0x158] sm:$0xff] }
  0x6c   :  { %1283 = vmatprep.mubr.bf16.mxu1 %v1820_v32 }
  0x6d   :  { %1213 = vmatpush1.bf16.msra.mxu0 %v1531_v46 }
  0x6e   :  { %1254 = vmatpush1.bf16.msra.mxu1 %v1533_v47  ;;  %1214 = vmatprep.subr.bf16.mxu0 %v1540_v48 }
  0x6f   :  { %1255 = vmatprep.subr.bf16.mxu1 %v1542_v49 }
  0x71   :  { %1215 = vmatpush1.bf16.msra.mxu0 %v1539_v54 }
  0x72   :  { %1256 = vmatpush1.bf16.msra.mxu1 %v1541_v55  ;;  %1216 = vmatprep.subr.bf16.mxu0 %v1548_v56 }
  0x73   :  { %1257 = vmatprep.subr.bf16.mxu1 %v1550_v57 }
  0x75   :  { %1217 = vmatpush1.bf16.msra.mxu0 %v1547_v62 }
  0x76   :  { %1258 = vmatpush1.bf16.msra.mxu1 %v1549_v63  ;;  %1218 = vmatprep.subr.bf16.mxu0 %v1556_v0  ;;  %v794_v0 = vld [vmem:[#allocation4 + $0x50] sm:$0xff] }
  0x77   :  { %1259 = vmatprep.subr.bf16.mxu1 %v1558_v1  ;;  %v798_v1 = vld [vmem:[#allocation4 + $0x70] sm:$0xff] }
  0x78   :  { %v1535_v12 = vcombine.low %v794_v0, %v798_v1 }
  0x79   :  { %1219 = vmatpush1.bf16.msra.mxu0 %v1555_v6  ;;  %v1536_v6 = vcombine.high %v794_v0, %v798_v1  ;;  %v864_v0 = vsub.s32 3, %v1875_v30 }
  0x7a   :  { %1260 = vmatpush1.bf16.msra.mxu1 %v1557_v7  ;;  %1220 = vmatprep.subr.bf16.mxu0 %v1564_v8  ;;  %v1538_v7 = vcombine.high %v795_v2, %v799_v3  ;;  %v802_v8 = vld [vmem:[#allocation4 + $0x90] sm:$0xff] }
  0x7b   :  { %1261 = vmatprep.subr.bf16.mxu1 %v1566_v9  ;;  %v806_v9 = vld [vmem:[#allocation4 + $0xb0] sm:$0xff] }
  0x7c   :  { %v1544_v14 = vcombine.high %v802_v8, %v806_v9  ;;  %v1543_v20 = vcombine.low %v802_v8, %v806_v9 }
  0x7d   :  { %1221 = vmatpush1.bf16.msra.mxu0 %v1563_v10  ;;  %v803_v10 = vld [vmem:[#allocation4 + $0x98] sm:$0xff] }
  0x7e   :  { %1262 = vmatpush1.bf16.msra.mxu1 %v1565_v11  ;;  %1222 = vmatprep.subr.bf16.mxu0 %v1572_v15  ;;  %v807_v11 = vld [vmem:[#allocation4 + $0xb8] sm:$0xff] }
  0x7f   :  { %1263 = vmatprep.subr.bf16.mxu1 %v1574_v19  ;;  %v1546_v15 = vcombine.high %v803_v10, %v807_v11  ;;  %v815_v19 = vld [vmem:[#allocation4 + $0xf8] sm:$0xff]  ;;  %v1545_v21 = vcombine.low %v803_v10, %v807_v11 }
  0x81   :  { %1223 = vmatpush1.bf16.msra.mxu0 %v1571_v17  ;;  %v814_v17 = vld [vmem:[#allocation4 + $0xf0] sm:$0xff] }
  0x82   :  { %1264 = vmatpush1.bf16.msra.mxu1 %v1573_v18  ;;  %1224 = vmatprep.subr.bf16.mxu0 %v1580_v23  ;;  %v811_v18 = vld [vmem:[#allocation4 + $0xd8] sm:$0xff]  ;;  %v1552_v22 = vcombine.high %v810_v16, %v814_v17  ;;  %v1551_v28 = vcombine.low %v810_v16, %v814_v17 }
  0x83   :  { %1265 = vmatprep.subr.bf16.mxu1 %v1582_v27  ;;  %v1554_v23 = vcombine.high %v811_v18, %v815_v19  ;;  %v823_v27 = vld [vmem:[#allocation4 + $0x138] sm:$0xff]  ;;  %v1553_v29 = vcombine.low %v811_v18, %v815_v19 }
  0x85   :  { %1225 = vmatpush1.bf16.msra.mxu0 %v1579_v25  ;;  %v822_v25 = vld [vmem:[#allocation4 + $0x130] sm:$0xff] }
  0x86   :  { %1266 = vmatpush1.bf16.msra.mxu1 %v1581_v26  ;;  %1292 = vmatprep.subr.bf16.mxu0 %v1528_v34  ;;  %v819_v26 = vld [vmem:[#allocation4 + $0x118] sm:$0xff]  ;;  %v1560_v31 = vcombine.high %v818_v24, %v822_v25  ;;  %v830_v34 = vld [vmem:[#allocation4 + $0x170] sm:$0xff] }
  0x87   :  { %1333 = vmatprep.subr.bf16.mxu1 %v1530_v38  ;;  %v1559_v38 = vcombine.low %v818_v24, %v822_v25 }
 0x11b   :  { %v1603_v39 = vpop.f32.mrb[0].mxu0 }
 0x11c   :  { %v1604_v41 = vpop.f32.mrb[1].mxu0  ;;  %v1625_v42 = vpop.f32.mrb[0].mxu1 }
 0x11d   :  { %v1605_v43 = vadd.f32 %v1604_v41, %v1603_v39  ;;  %v1606_v44 = vpop.f32.mrb[2].mxu0  ;;  %v1626_v45 = vpop.f32.mrb[1].mxu1  ;;  %v1561_v39 = vcombine.low %v819_v26, %v823_v27 }
 0x11e   :  { %v1607_v46 = vpop.f32.mrb[3].mxu0  ;;  %v1627_v48 = vadd.f32 %v1626_v45, %v1625_v42  ;;  %v1628_v49 = vpop.f32.mrb[2].mxu1  ;;  %v834_v42 = vld [vmem:[#allocation4 + $0x190] sm:$0xff]  ;;  %v835_v44 = vld [vmem:[#allocation4 + $0x198] sm:$0xff] }
 0x11f   :  { %v657_v47 = vadd.f32 %v1605_v43, %v1458_v40  ;;  %v1629_v50 = vpop.f32.mrb[3].mxu1  ;;  %v838_v43 = vld [vmem:[#allocation4 + $0x1b0] sm:$0xff]  ;;  %v839_v45 = vld [vmem:[#allocation4 + $0x1b8] sm:$0xff] }
 0x120   :  { %v1578_v49 = vcombine.high %v835_v44, %v839_v45  ;;  %v842_v50 = vld [vmem:[#allocation4 + $0x1d0] sm:$0xff] }
 0x121   :  { %v697_v51 = vadd.f32 %v1627_v48, %v657_v47  ;;  %v1576_v48 = vcombine.high %v834_v42, %v838_v43 }
 0x13b   :  { %v1647_v52 = vpop.f32.mrb[4].mxu0 }
 0x13c   :  { %v1648_v53 = vpop.f32.mrb[5].mxu0  ;;  %v1669_v54 = vpop.f32.mrb[4].mxu1 }
 0x13d   :  { %v1649_v55 = vadd.f32 %v1648_v53, %v1647_v52  ;;  %v1650_v56 = vpop.f32.mrb[6].mxu0  ;;  %v1670_v57 = vpop.f32.mrb[5].mxu1  ;;  %v843_v52 = vld [vmem:[#allocation4 + $0x1d8] sm:$0xff] }
 0x13e   :  { %v1651_v58 = vpop.f32.mrb[7].mxu0  ;;  %v1671_v60 = vadd.f32 %v1670_v57, %v1669_v54  ;;  %v1672_v61 = vpop.f32.mrb[6].mxu1  ;;  %v847_v53 = vld [vmem:[#allocation4 + $0x1f8] sm:$0xff]  ;;  %v1575_v54 = vcombine.low %v834_v42, %v838_v43  ;;  %v880_v42 = vsub.s32 7, %v1875_v30 }
 0x13f   :  { %v737_v59 = vadd.f32 %v1649_v55, %v697_v51  ;;  %v1673_v62 = vpop.f32.mrb[7].mxu1  ;;  %v846_v51 = vld [vmem:[#allocation4 + $0x1f0] sm:$0xff]  ;;  %v1577_v55 = vcombine.low %v835_v44, %v839_v45  ;;  %v1586_v57 = vcombine.high %v843_v52, %v847_v53  ;;  %v860_v61 = vsub.s32 2, %v1875_v30 }
 0x140   :  { %v1584_v56 = vcombine.high %v842_v50, %v846_v51  ;;  %v1583_v58 = vcombine.low %v842_v50, %v846_v51  ;;  %v848_v62 = vld [vmem:[%s1924_s4] sm:$0xff] }
 0x141   :  { %v777_v63 = vadd.f32 %v1671_v60, %v737_v59  ;;  %v1585_v59 = vcombine.low %v843_v52, %v847_v53  ;;  %v852_v60 = vsub.s32 0, %v1875_v30  ;;  %v861_v2 = vrot.slane %v848_v62, %v860_v61 }
 0x143   :  { %v782_v4 = vmax.f32 %v777_v63, 0.0  ;;  %v856_v63 = vsub.s32 1, %v1875_v30  ;;  %v853_v1 = vrot.slane %v848_v62, %v852_v60 }
 0x145   :  { %v1893_v5 = vpack.c.bf16 %v782_v4, %v782_v4  ;;  %v857_v3 = vrot.slane %v848_v62, %v856_v63  ;;  %v865_v4 = vrot.slane %v848_v62, %v864_v0 }
 0x147   :  { %1243 = vmatmul.mubr.bf16.vlgmr.msra.gmra.mrb[8].mxu0 %v1893_v5  ;;  %1284 = vmatmul.mubr.bf16.vlgmr.msra.gmra.mrb[8].mxu1 %v1893_v5 }
 0x148   :  { %1293 = vmatpush1.bf16.msra.mxu0 %v1527_v33  ;;  %1334 = vmatpush1.bf16.msra.mxu1 %v1529_v37  ;;  %v826_v33 = vld [vmem:[#allocation4 + $0x150] sm:$0xff]  ;;  %v831_v37 = vld [vmem:[#allocation4 + $0x178] sm:$0xff] }
 0x149   :  { %1294 = vmatprep.subr.bf16.mxu0 %v1536_v6  ;;  %1335 = vmatprep.subr.bf16.mxu1 %v1538_v7  ;;  %v1568_v40 = vcombine.high %v826_v33, %v830_v34  ;;  %v1570_v41 = vcombine.high %v827_v36, %v831_v37  ;;  %v1567_v46 = vcombine.low %v826_v33, %v830_v34 }
 0x14a   :  { %1324 = vmatprep.mubr.bf16.mxu0 %v1820_v32  ;;  %1365 = vmatprep.mubr.bf16.mxu1 %v1820_v32  ;;  %v1562_v32 = vcombine.high %v819_v26, %v823_v27  ;;  %v1569_v47 = vcombine.low %v827_v36, %v831_v37 }
 0x14c   :  { %1295 = vmatpush1.bf16.msra.mxu0 %v1535_v12  ;;  %1336 = vmatpush1.bf16.msra.mxu1 %v1537_v13 }
 0x14d   :  { %1296 = vmatprep.subr.bf16.mxu0 %v1544_v14  ;;  %1337 = vmatprep.subr.bf16.mxu1 %v1546_v15 }
 0x150   :  { %1297 = vmatpush1.bf16.msra.mxu0 %v1543_v20  ;;  %1338 = vmatpush1.bf16.msra.mxu1 %v1545_v21 }
 0x151   :  { %1298 = vmatprep.subr.bf16.mxu0 %v1552_v22  ;;  %1339 = vmatprep.subr.bf16.mxu1 %v1554_v23 }
 0x154   :  { %1299 = vmatpush1.bf16.msra.mxu0 %v1551_v28  ;;  %1340 = vmatpush1.bf16.msra.mxu1 %v1553_v29 }
 0x155   :  { %1300 = vmatprep.subr.bf16.mxu0 %v1560_v31  ;;  %1341 = vmatprep.subr.bf16.mxu1 %v1562_v32 }
 0x158   :  { %1301 = vmatpush1.bf16.msra.mxu0 %v1559_v38  ;;  %1342 = vmatpush1.bf16.msra.mxu1 %v1561_v39  ;;  %v868_v39 = vsub.s32 4, %v1875_v30 }
 0x159   :  { %1302 = vmatprep.subr.bf16.mxu0 %v1568_v40  ;;  %1343 = vmatprep.subr.bf16.mxu1 %v1570_v41  ;;  %v876_v40 = vsub.s32 6, %v1875_v30  ;;  %v872_v41 = vsub.s32 5, %v1875_v30 }
 0x15a   :  { %v869_v44 = vrot.slane %v848_v62, %v868_v39 }
 0x15b   :  { %v877_v45 = vrot.slane %v848_v62, %v876_v40 }
 0x15c   :  { %1303 = vmatpush1.bf16.msra.mxu0 %v1567_v46  ;;  %1344 = vmatpush1.bf16.msra.mxu1 %v1569_v47  ;;  %v873_v46 = vrot.slane %v848_v62, %v872_v41  ;;  %v881_v47 = vrot.slane %v848_v62, %v880_v42 }
 0x15d   :  { %1304 = vmatprep.subr.bf16.mxu0 %v1576_v48  ;;  %1345 = vmatprep.subr.bf16.mxu1 %v1578_v49 }
 0x160   :  { %1305 = vmatpush1.bf16.msra.mxu0 %v1575_v54  ;;  %1346 = vmatpush1.bf16.msra.mxu1 %v1577_v55 }
 0x161   :  { %1306 = vmatprep.subr.bf16.mxu0 %v1584_v56  ;;  %1347 = vmatprep.subr.bf16.mxu1 %v1586_v57 }
 0x164   :  { %1307 = vmatpush1.bf16.msra.mxu0 %v1583_v58  ;;  %1348 = vmatpush1.bf16.msra.mxu1 %v1585_v59 }
 0x167   :  { %1325 = vmatmul.mubr.bf16.vlgmr.msra.gmra.mrb[12].mxu0 %v1893_v5  ;;  %1366 = vmatmul.mubr.bf16.vlgmr.msra.gmra.mrb[12].mxu1 %v1893_v5 }
 0x21a   :  { %v1244_v6 = vpop.f32.mrb[8].mxu0  ;;  %v1285_v7 = vpop.f32.mrb[8].mxu1 }
 0x21b   :  { %v1245_v8 = vadd.f32 %v1244_v6, %v853_v1  ;;  %v1286_v5 = vadd.f32 %v1285_v7, %v861_v2  ;;  %v1246_v9 = vpop.f32.mrb[9].mxu0  ;;  %v1287_v10 = vpop.f32.mrb[9].mxu1 }
 0x21c   :  { %v1247_v11 = vadd.f32 %v1246_v9, %v857_v3  ;;  %v1288_v12 = vadd.f32 %v1287_v10, %v865_v4  ;;  %v1248_v13 = vpop.f32.mrb[10].mxu0  ;;  %v1289_v14 = vpop.f32.mrb[10].mxu1 }
 0x21d   :  { %v1374_v15 = vmul.f32 0.5, %v1245_v8  ;;  %v1376_v16 = vmul.f32 0.5, %v1286_v5  ;;  %v1249_v17 = vpop.f32.mrb[11].mxu0  ;;  %v1290_v18 = vpop.f32.mrb[11].mxu1 }
 0x21e   :  { %v1375_v19 = vmul.f32 0.5, %v1247_v11  ;;  %v1377_v20 = vmul.f32 0.5, %v1288_v12 }
 0x21f   :  { %1749 = vtanh.f32 %v1374_v15 }
 0x220   :  { %1751 = vtanh.f32 %v1376_v16 }
 0x221   :  { %1753 = vtanh.f32 %v1375_v19 }
 0x222   :  { %1755 = vtanh.f32 %v1377_v20 }
 0x229   :  { %v1750_v21 = vpop.eup %1749 }
 0x22a   :  { %v1752_v22 = vpop.eup %1751  ;;  %v1390_v23 = vadd.f32 1.0, %v1750_v21 }
 0x22b   :  { %v1754_v24 = vpop.eup %1753  ;;  %v1392_v25 = vadd.f32 1.0, %v1752_v22 }
 0x22c   :  { %v1756_v26 = vpop.eup %1755  ;;  %v1398_v27 = vmul.f32 0.5, %v1390_v23  ;;  %v1391_v28 = vadd.f32 1.0, %v1754_v24 }
 0x22d   :  { %v1400_v29 = vmul.f32 0.5, %v1392_v25  ;;  %v1393_v31 = vadd.f32 1.0, %v1756_v26 }
 0x22e   :  { %v1399_v32 = vmul.f32 0.5, %v1391_v28 }
 0x22f   :  { %v1401_v33 = vmul.f32 0.5, %v1393_v31 }
 0x230   :  { %v1414_v34 = vcombine.low %v1398_v27, %v1399_v32 }
 0x231   :  { %v1415_v36 = vcombine.low %v1400_v29, %v1401_v33 }
 0x232   :  { %v1422_v37 = vrot.slane %v1414_v34, %v1878_v35 }
 0x233   :  { %v1429_v38 = vrot.slane %v1415_v36, %v1878_v35 }
 0x235   :  { %v1430_v43 = vcombine.low %v1422_v37, %v1429_v38 }
 0x237   :  { %1450 = vst [vmem:[%s1925_s5] sm:$0xff] %v1430_v43 }
 0x23a   :  { %v1326_v48 = vpop.f32.mrb[12].mxu0  ;;  %v1367_v49 = vpop.f32.mrb[12].mxu1 }
 0x23b   :  { %v1327_v50 = vadd.f32 %v1326_v48, %v869_v44  ;;  %v1368_v51 = vadd.f32 %v1367_v49, %v877_v45  ;;  %v1328_v52 = vpop.f32.mrb[13].mxu0  ;;  %v1369_v53 = vpop.f32.mrb[13].mxu1 }
 0x23c   :  { %v1329_v54 = vadd.f32 %v1328_v52, %v873_v46  ;;  %v1370_v55 = vadd.f32 %v1369_v53, %v881_v47  ;;  %v1330_v56 = vpop.f32.mrb[14].mxu0  ;;  %v1371_v57 = vpop.f32.mrb[14].mxu1 }
 0x23d   :  { %v1378_v30 = vmul.f32 0.5, %v1327_v50  ;;  %v1380_v58 = vmul.f32 0.5, %v1368_v51  ;;  %v1331_v59 = vpop.f32.mrb[15].mxu0  ;;  %v1372_v60 = vpop.f32.mrb[15].mxu1 }
 0x23e   :  { %v1379_v61 = vmul.f32 0.5, %v1329_v54  ;;  %v1381_v63 = vmul.f32 0.5, %v1370_v55 }
 0x23f   :  { %1757 = vtanh.f32 %v1378_v30 }
 0x240   :  { %1759 = vtanh.f32 %v1380_v58 }
 0x241   :  { %1761 = vtanh.f32 %v1379_v61 }
 0x242   :  { %1763 = vtanh.f32 %v1381_v63 }
 0x249   :  { %v1758_v62 = vpop.eup %1757 }
 0x24a   :  { %v1760_v0 = vpop.eup %1759  ;;  %v1394_v1 = vadd.f32 1.0, %v1758_v62 }
 0x24b   :  { %v1762_v2 = vpop.eup %1761  ;;  %v1396_v3 = vadd.f32 1.0, %v1760_v0 }
 0x24c   :  { %v1764_v4 = vpop.eup %1763  ;;  %v1402_v6 = vmul.f32 0.5, %v1394_v1  ;;  %v1395_v7 = vadd.f32 1.0, %v1762_v2 }
 0x24d   :  { %v1404_v8 = vmul.f32 0.5, %v1396_v3  ;;  %v1397_v5 = vadd.f32 1.0, %v1764_v4 }
 0x24e   :  { %v1403_v9 = vmul.f32 0.5, %v1395_v7 }
 0x24f   :  { %v1405_v10 = vmul.f32 0.5, %v1397_v5 }
 0x250   :  { %v1431_v11 = vcombine.low %v1402_v6, %v1403_v9 }
 0x251   :  { %v1432_v12 = vcombine.low %v1404_v8, %v1405_v10 }
 0x252   :  { %v1439_v13 = vrot.slane %v1431_v11, %v1878_v35 }
 0x253   :  { %v1446_v14 = vrot.slane %v1432_v12, %v1878_v35 }
 0x255   :  { %v1447_v15 = vcombine.low %v1439_v13, %v1446_v14 }
 0x257   :  { %1451 = vst [vmem:[%s1925_s5 + $0x8] sm:$0xff] %v1447_v15 }
 0x258   :  { %1456 = vsyncpa [#allocation3], 1 }
 0x259   :  { %1457 = vsyncpa [#allocation5], 1 }

</bundles_post_ra>
